<compile_context>
chip_gen: v7x
topology: tpu7x:2x2x1
jax: 0.10.0
libtpu: 0.0.40
codegen_flags: <defaults>
</compile_context>

<pallas_src>
import math
import numpy as np
import jax
import jax.numpy as jnp
from jax.experimental import pallas as pl
from jax.experimental.pallas import tpu as pltpu


def _apply_activation(x, name):
    if name == "silu":
        return x * jax.lax.logistic(x)
    if name == "relu":
        return jnp.maximum(x, 0.0)
    if name == "gelu":
        return jax.nn.gelu(x)
    if name in ("identity", "none", None):
        return x
    raise ValueError(f"unsupported activation: {name}")


def _round_up(x, m):
    return ((x + m - 1) // m) * m


def _make_ae_kernel(activation_fn):
    def ae_kernel(xn_ref, xv_ref, wdn_ref, wdv_ref, wun_ref, wuv_ref,
                  kc_ref, v_ref):
        # Cast inputs to the compute dtype *after* the load: no separate
        # wrapper-side cast pass over the slab in HBM.
        cd = wdn_ref.dtype
        xn = xn_ref[...].astype(cd)
        xv = xv_ref[...].astype(cd)
        # Down projection with the concat fused away:
        #   c = [x_nope | x_v] @ W_down^T = x_nope @ Wd_n + x_v @ Wd_v
        # TODO(synk): if this ever becomes MXU-bound (large low_rank), present a
        # single K = d_in contraction instead of two short-K dots.
        c = jnp.dot(xn, wdn_ref[...], preferred_element_type=jnp.float32)
        c = c + jnp.dot(xv, wdv_ref[...], preferred_element_type=jnp.float32)
        c = _apply_activation(c, activation_fn).astype(cd)
        # Up projection split into the two output slabs (k_c, v).
        # TODO(synk): when per_head_nope < 128 the kc store is a masked vst;
        # making it lane-dense would need an in-kernel (bm, pn)->(bm/H, H*pn)
        # reshape, which Mosaic lowers via a VMEM relayout round-trip, so it is
        # intentionally left to the (free) wrapper-side reshape.
        kc_ref[...] = jnp.dot(c, wun_ref[...],
                              preferred_element_type=jnp.float32
                              ).astype(kc_ref.dtype)
        v_ref[...] = jnp.dot(c, wuv_ref[...],
                             preferred_element_type=jnp.float32
                             ).astype(v_ref.dtype)
    return ae_kernel


def _vmem_capacity_bytes():
    try:
        info = pltpu.get_tpu_info()
        cap = getattr(info, "vmem_capacity_bytes", None)
        if cap:
            return int(cap)
    except Exception:
        pass
    return 64 * 1024 * 1024   # conservative (v7x per-TC size)


def _choose_block_m(M, d_in, low_rank_p, in_bytes, out_bytes, cmp_bytes,
                    vmem_cap):
    """Pick a row tile: big enough to amortize per-step overhead (~0.35us),
    small enough that double-buffered I/O + f32 temporaries fit comfortably in
    VMEM, and shaped so the grid has an even number of >= 2 steps when M allows
    (v7x dual-TensorCore sharding of the "parallel" row axis)."""
    align = 16   # sublane-aligned for bf16 packing (and a multiple of 8 for f32)
    if M <= align:
        return M
    # VMEM bytes tied up per tile row: double-buffered input+output blocks,
    # plus single-buffered compute-dtype casts, f32 c, and f32 matmul results.
    per_row = (2 * d_in * (in_bytes + out_bytes)
               + d_in * cmp_bytes
               + low_rank_p * 4
               + d_in * 4)
    budget = min(int(0.35 * vmem_cap), 24 * 1024 * 1024)
    bm = max(align, budget // max(per_row, 1))
    bm = min(bm, 8192)                      # 4k-8k sweet spot for this d_in
    bm = min(bm, _round_up(M, align))
    steps = pl.cdiv(M, bm)
    if M > 2 * align:
        steps = max(steps, 2)
        if steps % 2:
            steps += 1
        bm = _round_up(pl.cdiv(M, steps), align)
    else:
        bm = M
    return int(min(bm, M))


def ae_forward_pallas(x_nope, x_v, w_down_n, w_down_v, w_up_n, w_up_v,
                      activation_fn, *, out_dtype=None, block_m=None):
    """x_nope: (M, d_nope); x_v: (M, d_head); weights pre-split/pre-transposed
    (and low_rank possibly zero-padded).  Returns (k_c, v_out)."""
    M, d_nope = x_nope.shape
    _, d_head = x_v.shape
    low_rank_p = w_down_n.shape[1]
    d_in = d_nope + d_head
    if out_dtype is None:
        out_dtype = x_nope.dtype

    in_bytes = jnp.dtype(x_nope.dtype).itemsize
    out_bytes = jnp.dtype(out_dtype).itemsize
    cmp_bytes = jnp.dtype(w_down_n.dtype).itemsize
    vmem_cap = _vmem_capacity_bytes()

    if block_m is None:
        block_m = _choose_block_m(M, d_in, low_rank_p, in_bytes, out_bytes,
                                  cmp_bytes, vmem_cap)
    else:
        block_m = min(block_m, M)
        if block_m < M and block_m % 8 != 0:
            block_m = max(8, (block_m // 8) * 8)   # sublane-aligned tile
    grid = (pl.cdiv(M, block_m),)

    # VMEM accounting: double-buffered I/O tiles, (conservatively) double-
    # buffered grid-invariant weights, and the f32/compute-dtype intermediates.
    w_bytes = 2 * d_in * low_rank_p * cmp_bytes
    blk_io_bytes = block_m * d_in * (in_bytes + out_bytes)
    tmp_bytes = block_m * (d_in * cmp_bytes + low_rank_p * 4 + d_in * 4)
    vmem_need = 2 * blk_io_bytes + 2 * w_bytes + tmp_bytes
    # Never request more than ~75% of physical VMEM (headroom for compiler
    # scratch / semaphores); allow > 64 MiB on v5e/v6e, ~48 MiB on v7x.
    vmem_limit = int(min(max(int(1.5 * vmem_need), 16 * 1024 * 1024),
                         int(0.75 * vmem_cap)))

    flops = 4 * M * d_in * low_rank_p                      # two matmuls
    transcendentals = M * low_rank_p if activation_fn in ("silu", "gelu") else 0
    bytes_accessed = M * d_in * (in_bytes + out_bytes) + w_bytes

    kernel = _make_ae_kernel(activation_fn)
    return pl.pallas_call(
        kernel,
        out_shape=(jax.ShapeDtypeStruct((M, d_nope), out_dtype),
                   jax.ShapeDtypeStruct((M, d_head), out_dtype)),
        grid_spec=pltpu.PrefetchScalarGridSpec(
            num_scalar_prefetch=0,
            grid=grid,
            in_specs=[
                pl.BlockSpec((block_m, d_nope), lambda i: (i, 0)),
                pl.BlockSpec((block_m, d_head), lambda i: (i, 0)),
                # weights: grid-invariant (constant index_map -> fetched once)
                pl.BlockSpec((d_nope, low_rank_p), lambda i: (0, 0)),
                pl.BlockSpec((d_head, low_rank_p), lambda i: (0, 0)),
                pl.BlockSpec((low_rank_p, d_nope), lambda i: (0, 0)),
                pl.BlockSpec((low_rank_p, d_head), lambda i: (0, 0)),
            ],
            out_specs=[
                pl.BlockSpec((block_m, d_nope), lambda i: (i, 0)),
                pl.BlockSpec((block_m, d_head), lambda i: (i, 0)),
            ],
        ),
        compiler_params=pltpu.CompilerParams(
            dimension_semantics=("parallel",),
            vmem_limit_bytes=vmem_limit),
        cost_estimate=pl.CostEstimate(
            flops=flops,
            transcendentals=transcendentals,
            bytes_accessed=bytes_accessed),
    )(x_nope, x_v, w_down_n, w_down_v, w_up_n, w_up_v)


class AutoEncoderV3:
    """JAX/Pallas port of the PyTorch AutoEncoderV3 (no KV-cache path)."""

    def __init__(self, config, layer_idx, nope_mask, key,
                 compute_dtype=jnp.bfloat16):
        self.config = config
        self.layer_idx = layer_idx
        self.nope_mask = np.asarray(nope_mask, dtype=bool)
        self.compute_dtype = compute_dtype

        H = config["num_key_value_heads"]
        head_dim = config["head_dim"]
        total = self.nope_mask.shape[-1]
        nope_total = int(self.nope_mask.sum())
        rope_total = total - nope_total
        assert nope_total % H == 0
        self.per_head_nope = nope_total // H
        self.d_in = self.per_head_nope + head_dim
        self.low_rank = config["AE"]["low_rank"]
        # Pad low_rank up to 128 when smaller: padded W_down columns and the
        # matching W_up rows are zero, so results are numerically exact while
        # the activation vregs / MXU contractions are lane-filled.
        self.low_rank_pad = self.low_rank if self.low_rank >= 128 else 128

        # nn.Linear(d_in, low_rank, bias=False).weight: (low_rank, d_in)
        # nn.Linear(low_rank, d_in, bias=False).weight: (d_in, low_rank)
        # Stored pre-transposed (ready for X @ W^T), pre-split along d_in, and
        # zero-padded along low_rank.
        k1, k2 = jax.random.split(key)
        bound_d = 1.0 / math.sqrt(self.d_in)     # torch kaiming-uniform bound
        bound_u = 1.0 / math.sqrt(self.low_rank)
        w_down_t = jax.random.uniform(
            k1, (self.d_in, self.low_rank), jnp.float32, -bound_d, bound_d)
        w_up_t = jax.random.uniform(
            k2, (self.low_rank, self.d_in), jnp.float32, -bound_u, bound_u)
        self.w_down_t_f32 = w_down_t          # f32 masters for the reference
        self.w_up_t_f32 = w_up_t

        pad = self.low_rank_pad - self.low_rank
        if pad:
            w_down_p = jnp.concatenate(
                [w_down_t, jnp.zeros((self.d_in, pad), jnp.float32)], axis=1)
            w_up_p = jnp.concatenate(
                [w_up_t, jnp.zeros((pad, self.d_in), jnp.float32)], axis=0)
        else:
            w_down_p, w_up_p = w_down_t, w_up_t

        pn = self.per_head_nope
        self.w_down_n = w_down_p[:pn, :].astype(compute_dtype)
        self.w_down_v = w_down_p[pn:, :].astype(compute_dtype)
        self.w_up_n = w_up_p[:, :pn].astype(compute_dtype)
        self.w_up_v = w_up_p[:, pn:].astype(compute_dtype)

        # Output assembly plan.  Common MLA layout: within each head the first
        # per_head_nope key dims are "nope" -> a free per-head reshape + one
        # concat rebuilds key_states with NO gather.  Otherwise fall back to a
        # single static gather by the inverse permutation (never TPU scatters).
        self.nope_first_per_head = False
        if (total % H == 0 and rope_total % H == 0 and total // H > 0):
            pht = total // H
            mh = self.nope_mask.reshape(H, pht)
            if (mh == mh[0]).all() and mh[0, :pn].all() and not mh[0, pn:].any():
                self.nope_first_per_head = True
        nope_idx = np.nonzero(self.nope_mask)[0]
        rope_idx = np.nonzero(~self.nope_mask)[0]
        perm = np.empty((total,), np.int32)
        perm[nope_idx] = np.arange(nope_idx.size, dtype=np.int32)
        perm[rope_idx] = nope_idx.size + np.arange(rope_idx.size, dtype=np.int32)
        self.out_perm = jnp.asarray(perm)

    # TODO(synk): past_key_value cache update (Cache.update) has no clean
    # Pallas equivalent here; only the past_key_value=None path is implemented.
    def __call__(self, k_r, k_nope, value_states, block_m=None):
        cfg = self.config
        H = cfg["num_key_value_heads"]
        head_dim = cfg["head_dim"]
        bsz, q_len, _ = k_nope.shape
        out_dtype = k_nope.dtype
        M = bsz * q_len * H

        # Contiguous reshapes only (free). No wrapper-side dtype cast: the
        # kernel casts to the compute dtype after the VMEM load.
        x_nope = k_nope.reshape(M, self.per_head_nope)
        x_v = value_states.reshape(M, head_dim)

        k_c, v_out = ae_forward_pallas(
            x_nope, x_v,
            self.w_down_n, self.w_down_v, self.w_up_n, self.w_up_v,
            cfg["AE"]["activation_fn"], out_dtype=out_dtype, block_m=block_m)

        v_out = v_out.reshape(bsz, q_len, H * head_dim)
        k_r = k_r.astype(out_dtype)

        if self.nope_first_per_head:
            # Free reshapes + one concat pass; no lane gather at all.
            pr = k_r.shape[-1] // H
            key_states = jnp.concatenate(
                [k_c.reshape(bsz, q_len, H, self.per_head_nope),
                 k_r.reshape(bsz, q_len, H, pr)], axis=-1
            ).reshape(bsz, q_len, self.nope_mask.shape[-1])
        else:
            # General mask: single static gather by the inverse permutation.
            key_states = jnp.take(
                jnp.concatenate(
                    [k_c.reshape(bsz, q_len, H * self.per_head_nope), k_r],
                    axis=-1),
                self.out_perm, axis=-1)
        return key_states, v_out

    # Pure-JAX f32 reference (no Pallas) for correctness checks.
    def reference(self, k_r, k_nope, value_states):
        cfg = self.config
        H = cfg["num_key_value_heads"]
        head_dim = cfg["head_dim"]
        bsz, q_len, _ = k_nope.shape
        kv = jnp.concatenate(
            [k_nope.reshape(bsz, q_len, H, self.per_head_nope),
             value_states.reshape(bsz, q_len, H, head_dim)], axis=-1)
        c = _apply_activation(kv @ self.w_down_t_f32,
                              cfg["AE"]["activation_fn"])
        y = c @ self.w_up_t_f32
        k_c = y[..., :self.per_head_nope].reshape(bsz, q_len, -1)
        v_out = y[..., self.per_head_nope:].reshape(bsz, q_len, H * head_dim)
        nope_idx = jnp.asarray(np.nonzero(self.nope_mask)[0])
        rope_idx = jnp.asarray(np.nonzero(~self.nope_mask)[0])
        key_states = jnp.zeros((bsz, q_len, self.nope_mask.shape[-1]),
                               dtype=k_nope.dtype)
        key_states = key_states.at[..., nope_idx].set(k_c)
        key_states = key_states.at[..., rope_idx].set(k_r)
        return key_states, v_out


if __name__ == "__main__":
    # small, forward-consistent shapes
    batch, q_len = 2, 8
    num_kv_heads, head_dim = 2, 16
    total_k_dim = num_kv_heads * head_dim          # 32 = nope_mask.shape[-1]
    low_rank = 8

    config = {
        "num_key_value_heads": num_kv_heads,
        "head_dim": head_dim,
        "AE": {"low_rank": low_rank, "activation_fn": "silu"},
    }

    root = jax.random.PRNGKey(0)
    k_params, k_kr, k_knope, k_v = jax.random.split(root, 4)

    # --- mask A: common MLA layout (per head, nope dims come first) -----------
    nope_mask_a = np.zeros((total_k_dim,), dtype=bool)
    nope_mask_a.reshape(num_kv_heads, total_k_dim // num_kv_heads)[:, :8] = True
    nope_total = int(nope_mask_a.sum())            # 16
    rope_total = total_k_dim - nope_total          # 16

    k_r = jax.random.normal(k_kr, (batch, q_len, rope_total), jnp.float32)
    k_nope = jax.random.normal(k_knope, (batch, q_len, nope_total), jnp.float32)
    value_states = jax.random.normal(
        k_v, (batch, q_len, num_kv_heads * head_dim), jnp.float32)

    # f32 path, multi-step grid (block_m=16 -> 2 grid steps), tight tolerance,
    # exercising the no-gather per-head output assembly.
    mod_f32 = AutoEncoderV3(config, layer_idx=0, nope_mask=nope_mask_a,
                            key=k_params, compute_dtype=jnp.float32)
    key_states, v_out = mod_f32(k_r, k_nope, value_states, block_m=16)
    jax.block_until_ready((key_states, v_out))
    ref_key, ref_v = mod_f32.reference(k_r, k_nope, value_states)
    np.testing.assert_allclose(np.asarray(key_states), np.asarray(ref_key),
                               rtol=1e-5, atol=1e-5)
    np.testing.assert_allclose(np.asarray(v_out), np.asarray(ref_v),
                               rtol=1e-5, atol=1e-5)
    assert key_states.shape == (batch, q_len, total_k_dim)
    assert v_out.shape == (batch, q_len, num_kv_heads * head_dim)

    # Default (bf16 weights/compute, f32 accumulation, in-kernel cast), default
    # block_m, loose tolerance.
    mod_bf16 = AutoEncoderV3(config, layer_idx=0, nope_mask=nope_mask_a,
                             key=k_params)
    key_states_b, v_out_b = mod_bf16(k_r, k_nope, value_states)
    jax.block_until_ready((key_states_b, v_out_b))
    np.testing.assert_allclose(np.asarray(key_states_b), np.asarray(ref_key),
                               rtol=5e-2, atol=5e-2)
    np.testing.assert_allclose(np.asarray(v_out_b), np.asarray(ref_v),
                               rtol=5e-2, atol=5e-2)

    # --- mask B: interleaved mask -> general gather fallback, f32, tight ------
    nope_mask_b = np.zeros((total_k_dim,), dtype=bool)
    nope_mask_b[0::2] = True
    mod_gen = AutoEncoderV3(config, layer_idx=0, nope_mask=nope_mask_b,
                            key=k_params, compute_dtype=jnp.float32)
    key_states_g, v_out_g = mod_gen(k_r, k_nope, value_states)
    jax.block_until_ready((key_states_g, v_out_g))
    ref_key_g, ref_v_g = mod_gen.reference(k_r, k_nope, value_states)
    np.testing.assert_allclose(np.asarray(key_states_g), np.asarray(ref_key_g),
                               rtol=1e-5, atol=1e-5)
    np.testing.assert_allclose(np.asarray(v_out_g), np.asarray(ref_v_g),
                               rtol=1e-5, atol=1e-5)

    print("KERNEL_OK")
</pallas_src>

<mosaic_0001>
module attributes {stable_mosaic.version = 11 : i64} {
  func.func @ae_kernel(%arg0: i32, %arg1: memref<16x8xf32, #tpu.memory_space<vmem>>, %arg2: memref<16x16xf32, #tpu.memory_space<vmem>>, %arg3: memref<8x128xf32, #tpu.memory_space<vmem>>, %arg4: memref<16x128xf32, #tpu.memory_space<vmem>>, %arg5: memref<128x8xf32, #tpu.memory_space<vmem>>, %arg6: memref<128x16xf32, #tpu.memory_space<vmem>>, %arg7: memref<16x8xf32, #tpu.memory_space<vmem>>, %arg8: memref<16x16xf32, #tpu.memory_space<vmem>>) attributes {dimension_semantics = [#tpu.dimension_semantics<parallel>], iteration_bounds = array<i64: 2>, scalar_prefetch = 0 : i64, scratch_operands = 0 : i64, tpu.core_type = #tpu.core_type<tc>, window_params = [{transform_indices = @transform_0, window_bounds = array<i64: 16, 8>}, {transform_indices = @transform_1, window_bounds = array<i64: 16, 16>}, {pipeline_mode = #tpu.pipeline_mode<synchronous>, transform_indices = @transform_2, window_bounds = array<i64: 8, 128>}, {pipeline_mode = #tpu.pipeline_mode<synchronous>, transform_indices = @transform_3, window_bounds = array<i64: 16, 128>}, {pipeline_mode = #tpu.pipeline_mode<synchronous>, transform_indices = @transform_4, window_bounds = array<i64: 128, 8>}, {pipeline_mode = #tpu.pipeline_mode<synchronous>, transform_indices = @transform_5, window_bounds = array<i64: 128, 16>}, {transform_indices = @transform_6, window_bounds = array<i64: 16, 8>}, {transform_indices = @transform_7, window_bounds = array<i64: 16, 16>}]} {
    %c0 = arith.constant 0 : index
    %c0_0 = arith.constant 0 : index
    %0 = vector.load %arg1[%c0, %c0_0] : memref<16x8xf32, #tpu.memory_space<vmem>>, vector<16x8xf32>
    %c0_1 = arith.constant 0 : index
    %c0_2 = arith.constant 0 : index
    %1 = vector.load %arg2[%c0_1, %c0_2] : memref<16x16xf32, #tpu.memory_space<vmem>>, vector<16x16xf32>
    %c0_3 = arith.constant 0 : index
    %c0_4 = arith.constant 0 : index
    %2 = vector.load %arg3[%c0_3, %c0_4] : memref<8x128xf32, #tpu.memory_space<vmem>>, vector<8x128xf32>
    %cst = arith.constant dense<0.000000e+00> : vector<16x128xf32>
    %3 = tpu.matmul %0, %2, %cst {dimension_numbers = #tpu.dot_dimension_numbers<[1], [0], [0], [1], [0, 0, 1, 1], [], []>} : vector<16x8xf32>, vector<8x128xf32>, vector<16x128xf32> -> vector<16x128xf32>
    %c0_5 = arith.constant 0 : index
    %c0_6 = arith.constant 0 : index
    %4 = vector.load %arg4[%c0_5, %c0_6] : memref<16x128xf32, #tpu.memory_space<vmem>>, vector<16x128xf32>
    %cst_7 = arith.constant dense<0.000000e+00> : vector<16x128xf32>
    %5 = tpu.matmul %1, %4, %cst_7 {dimension_numbers = #tpu.dot_dimension_numbers<[1], [0], [0], [1], [0, 0, 1, 1], [], []>} : vector<16x16xf32>, vector<16x128xf32>, vector<16x128xf32> -> vector<16x128xf32>
    %6 = arith.addf %3, %5 : vector<16x128xf32>
    %7 = arith.negf %6 : vector<16x128xf32>
    %8 = math.exp %7 : vector<16x128xf32>
    %cst_8 = arith.constant 1.000000e+00 : f32
    %9 = vector.broadcast %cst_8 : f32 to vector<16x128xf32>
    %10 = arith.addf %9, %8 : vector<16x128xf32>
    %11 = arith.divf %9, %10 : vector<16x128xf32>
    %12 = arith.mulf %6, %11 : vector<16x128xf32>
    %c0_9 = arith.constant 0 : index
    %c0_10 = arith.constant 0 : index
    %13 = vector.load %arg5[%c0_9, %c0_10] : memref<128x8xf32, #tpu.memory_space<vmem>>, vector<128x8xf32>
    %cst_11 = arith.constant dense<0.000000e+00> : vector<16x8xf32>
    %14 = tpu.matmul %12, %13, %cst_11 {dimension_numbers = #tpu.dot_dimension_numbers<[1], [0], [0], [1], [0, 0, 1, 1], [], []>} : vector<16x128xf32>, vector<128x8xf32>, vector<16x8xf32> -> vector<16x8xf32>
    %c0_12 = arith.constant 0 : index
    %c0_13 = arith.constant 0 : index
    %15 = vector.load %arg7[%c0_12, %c0_13] : memref<16x8xf32, #tpu.memory_space<vmem>>, vector<16x8xf32>
    tpu.vector_store %arg7[%c0_12, %c0_13], %14 {strides = array<i32>} : memref<16x8xf32, #tpu.memory_space<vmem>>, vector<16x8xf32>,
    %c0_14 = arith.constant 0 : index
    %c0_15 = arith.constant 0 : index
    %16 = vector.load %arg6[%c0_14, %c0_15] : memref<128x16xf32, #tpu.memory_space<vmem>>, vector<128x16xf32>
    %cst_16 = arith.constant dense<0.000000e+00> : vector<16x16xf32>
    %17 = tpu.matmul %12, %16, %cst_16 {dimension_numbers = #tpu.dot_dimension_numbers<[1], [0], [0], [1], [0, 0, 1, 1], [], []>} : vector<16x128xf32>, vector<128x16xf32>, vector<16x16xf32> -> vector<16x16xf32>
    %c0_17 = arith.constant 0 : index
    %c0_18 = arith.constant 0 : index
    %18 = vector.load %arg8[%c0_17, %c0_18] : memref<16x16xf32, #tpu.memory_space<vmem>>, vector<16x16xf32>
    tpu.vector_store %arg8[%c0_17, %c0_18], %17 {strides = array<i32>} : memref<16x16xf32, #tpu.memory_space<vmem>>, vector<16x16xf32>,
    return
  }
  func.func @transform_0(%arg0: i32) -> (i32, i32) {
    %c0_i32 = arith.constant 0 : i32
    %c0_i32_0 = arith.constant 0 : i32
    return %arg0, %c0_i32 : i32, i32
  }
  func.func @transform_1(%arg0: i32) -> (i32, i32) {
    %c0_i32 = arith.constant 0 : i32
    %c0_i32_0 = arith.constant 0 : i32
    return %arg0, %c0_i32 : i32, i32
  }
  func.func @transform_2(%arg0: i32) -> (i32, i32) {
    %c0_i32 = arith.constant 0 : i32
    %c0_i32_0 = arith.constant 0 : i32
    %c0_i32_1 = arith.constant 0 : i32
    return %c0_i32, %c0_i32_0 : i32, i32
  }
  func.func @transform_3(%arg0: i32) -> (i32, i32) {
    %c0_i32 = arith.constant 0 : i32
    %c0_i32_0 = arith.constant 0 : i32
    %c0_i32_1 = arith.constant 0 : i32
    return %c0_i32, %c0_i32_0 : i32, i32
  }
  func.func @transform_4(%arg0: i32) -> (i32, i32) {
    %c0_i32 = arith.constant 0 : i32
    %c0_i32_0 = arith.constant 0 : i32
    %c0_i32_1 = arith.constant 0 : i32
    return %c0_i32, %c0_i32_0 : i32, i32
  }
  func.func @transform_5(%arg0: i32) -> (i32, i32) {
    %c0_i32 = arith.constant 0 : i32
    %c0_i32_0 = arith.constant 0 : i32
    %c0_i32_1 = arith.constant 0 : i32
    return %c0_i32, %c0_i32_0 : i32, i32
  }
  func.func @transform_6(%arg0: i32) -> (i32, i32) {
    %c0_i32 = arith.constant 0 : i32
    %c0_i32_0 = arith.constant 0 : i32
    return %arg0, %c0_i32 : i32, i32
  }
  func.func @transform_7(%arg0: i32) -> (i32, i32) {
    %c0_i32 = arith.constant 0 : i32
    %c0_i32_0 = arith.constant 0 : i32
    return %arg0, %c0_i32 : i32, i32
  }
}

</mosaic_0001>

<bundles_post_ra>
// kernel: tpu_custom_call.1
= control target key start
LH: loop header
LB: loop body
LE: loop exit
PB: predicated region body
PF: predicated region fallthrough
CT: control target
= control target key end

     0   :  { %s1071_s24 = smov 0   ;;  %s1213_s0 = inlined_call_operand.vmem [shape: f32[32,8], index: 0, kind: input, shape index: {}]   ;;  %s1214_s1 = inlined_call_operand.vmem [shape: f32[32,16], index: 1, kind: input, shape index: {}]   ;;  %s1215_s2 = inlined_call_operand.vmem [shape: f32[8,128], index: 2, kind: input, shape index: {}]   ;;  %s1216_s3 = inlined_call_operand.vmem [shape: f32[16,128], index: 3, kind: input, shape index: {}]   ;;  %s1217_s4 = inlined_call_operand.vmem [shape: f32[128,8], index: 4, kind: input, shape index: {}]   ;;  %s1218_s5 = inlined_call_operand.vmem [shape: f32[128,16], index: 5, kind: input, shape index: {}]   ;;  %s1219_s6 = inlined_call_operand.vmem [shape: f32[32,8], index: 6, kind: output, shape index: {0}]   ;;  %s1220_s7 = inlined_call_operand.vmem [shape: f32[32,16], index: 7, kind: output, shape index: {1}]  }
   0x1 LB: > { %s791_s25 = sadd.s32 4294967295, %s1029_s24   ;;  %p795_p0 = scmp.ge.s32.totalorder %s1029_s24, 1  ;;  %s1029_s24 = sphi %s1071_s24, %s18_s24  }
   0x2   : > { %p252_p1 = scmp.lt.s32.totalorder %s1029_s24, 3 }
   0x4   : > { %p253_p2 = pnand %p795_p0, %p252_p1 }
   0x5   : > { %v323_v0 = vld [vmem:[%s1216_s3] sm:$0xff] (!%p253_p2)  ;;  %v324_v1 = vld [vmem:[%s1216_s3 + $0x8] sm:$0xff] (!%p253_p2)  ;;  %s796_s9 = sshll.u32 (!%p253_p2), %s791_s25, 1  ;;  %vm325_vm0 = vcmask (!%p253_p2), 130048   ;;  %vm407_vm1 = vcmask (!%p253_p2), 64512   ;;  %v505_v14 = vld [vmem:[%s1217_s4 + $0x10] sm:$0xff] (!%p253_p2) }
   0x6   : > { %256 = sbr.rel (%p253_p2) target bundleno = 478 (0x1de), region = 44  ;;  %v322_v2 = vld [vmem:[%s1215_s2] sm:$0xff] (!%p253_p2)  ;;  %v937_v3 = vpack.c.bf16 (!%p253_p2), %v324_v1, %v323_v0  ;;  %p295_p3 = scmp.lt.s32.totalorder (!%p253_p2), %s796_s9, 3  ;;  %v504_v9 = vld [vmem:[%s1217_s4 + $0x8] sm:$0xff] (!%p253_p2)  ;;  %v506_v15 = vld [vmem:[%s1217_s4 + $0x18] sm:$0xff] (!%p253_p2) }
   0x7   : > { %862 = vmatprep.subr.mxu0 (!%p253_p2), %v322_v2  ;;  %v503_v8 = vld [vmem:[%s1217_s4] sm:$0xff] (!%p253_p2)  ;;  %v597_v12 = vld [vmem:[%s1218_s5 + $0x8] sm:$0xff] (!%p253_p2)  ;;  %v598_v16 = vld [vmem:[%s1218_s5 + $0x10] sm:$0xff] (!%p253_p2)  ;;  %v945_v17 = vpack.c.bf16 (!%p253_p2), %v506_v15, %v505_v14 }
   0x8   : > { %863 = vmatpush3.msra.mxu0 (!%p253_p2), %v322_v2  ;;  %938 = vmatprep.subr.bf16.mxu1 (!%p253_p2), %v937_v3  ;;  %v596_v10 = vld [vmem:[%s1218_s5] sm:$0xff] (!%p253_p2)  ;;  %v941_v11 = vpack.c.bf16 (!%p253_p2), %v504_v9, %v503_v8  ;;  %v599_v18 = vld [vmem:[%s1218_s5 + $0x18] sm:$0xff] (!%p253_p2)  ;;  %v508_v21 = vld [vmem:[%s1217_s4 + $0x28] sm:$0xff] (!%p253_p2) }
   0x9   : > { %940 = vmatpush3.bf16.msra.mxu1 (!%p253_p2), %v937_v3  ;;  %v973_v13 = vpack.c.bf16 (!%p253_p2), %v597_v12, %v596_v10  ;;  %v977_v19 = vpack.c.bf16 (!%p253_p2), %v599_v18, %v598_v16  ;;  %v507_v20 = vld [vmem:[%s1217_s4 + $0x20] sm:$0xff] (!%p253_p2)  ;;  %v601_v24 = vld [vmem:[%s1218_s5 + $0x28] sm:$0xff] (!%p253_p2)  ;;  %v509_v26 = vld [vmem:[%s1217_s4 + $0x30] sm:$0xff] (!%p253_p2) }
   0xa   : > { %942 = vmatprep.subr.bf16.mxu1 (!%p253_p2), %v941_v11  ;;  %v600_v22 = vld [vmem:[%s1218_s5 + $0x20] sm:$0xff] (!%p253_p2)  ;;  %v949_v23 = vpack.c.bf16 (!%p253_p2), %v508_v21, %v507_v20  ;;  %v510_v27 = vld [vmem:[%s1217_s4 + $0x38] sm:$0xff] (!%p253_p2)  ;;  %v602_v28 = vld [vmem:[%s1218_s5 + $0x30] sm:$0xff] (!%p253_p2) }
   0xb   : > { %974 = vmatprep.subr.bf16.mxu0 (!%p253_p2), %v973_v13  ;;  %v981_v25 = vpack.c.bf16 (!%p253_p2), %v601_v24, %v600_v22  ;;  %v953_v29 = vpack.c.bf16 (!%p253_p2), %v510_v27, %v509_v26  ;;  %v603_v30 = vld [vmem:[%s1218_s5 + $0x38] sm:$0xff] (!%p253_p2)  ;;  %v511_v32 = vld [vmem:[%s1217_s4 + $0x40] sm:$0xff] (!%p253_p2)  ;;  %v512_v33 = vld [vmem:[%s1217_s4 + $0x48] sm:$0xff] (!%p253_p2) }
   0xc   : > { %v985_v31 = vpack.c.bf16 (!%p253_p2), %v603_v30, %v602_v28  ;;  %v604_v34 = vld [vmem:[%s1218_s5 + $0x40] sm:$0xff] (!%p253_p2)  ;;  %v957_v35 = vpack.c.bf16 (!%p253_p2), %v512_v33, %v511_v32  ;;  %v605_v36 = vld [vmem:[%s1218_s5 + $0x48] sm:$0xff] (!%p253_p2)  ;;  %v513_v38 = vld [vmem:[%s1217_s4 + $0x50] sm:$0xff] (!%p253_p2) }
   0xd   : > { %s1222_s9 = smov (!%p295_p3, %s796_s9), 3  ;;  %v989_v37 = vpack.c.bf16 %v605_v36, %v604_v34  ;;  %v514_v39 = vld [vmem:[%s1217_s4 + $0x58] sm:$0xff]  ;;  %v606_v40 = vld [vmem:[%s1218_s5 + $0x50] sm:$0xff]  ;;  %v515_v44 = vld [vmem:[%s1217_s4 + $0x60] sm:$0xff] }
   0xe   : > { %s1088_s10 = sshll.u32 %s1222_s9, 3  ;;  %v961_v41 = vpack.c.bf16 %v514_v39, %v513_v38  ;;  %v607_v42 = vld [vmem:[%s1218_s5 + $0x58] sm:$0xff]  ;;  %v516_v45 = vld [vmem:[%s1217_s4 + $0x68] sm:$0xff]  ;;  %v608_v46 = vld [vmem:[%s1218_s5 + $0x60] sm:$0xff] }
   0xf   : > { %s304_s13 = scalar_lea.vmem %s1214_s1, %s1088_s10  ;;  %s298_s16 = scalar_lea.vmem %s1213_s0, %s1088_s10  ;;  %v993_v43 = vpack.c.bf16 %v607_v42, %v606_v40  ;;  %v965_v47 = vpack.c.bf16 %v516_v45, %v515_v44  ;;  %v609_v48 = vld [vmem:[%s1218_s5 + $0x68] sm:$0xff]  ;;  %v517_v50 = vld [vmem:[%s1217_s4 + $0x70] sm:$0xff]  ;;  %v518_v51 = vld [vmem:[%s1217_s4 + $0x78] sm:$0xff] }
  0x10   : > { %v320_v4 = vld [vmem:[%s304_s13] sm:$0xff]  ;;  %v321_v5 = vld [vmem:[%s304_s13 + $0x8] sm:$0xff]  ;;  %v997_v49 = vpack.c.bf16 %v609_v48, %v608_v46  ;;  %v610_v52 = vld [vmem:[%s1218_s5 + $0x70] sm:$0xff]  ;;  %v969_v53 = vpack.c.bf16 %v518_v51, %v517_v50  ;;  %s310_s20 = scalar_lea.vmem %s1219_s6, %s1088_s10  ;;  %s316_s23 = scalar_lea.vmem %s1220_s7, %s1088_s10 }
  0x11   : > { %v318_v6 = vld [vmem:[%s298_s16] sm:$0xff]  ;;  %859 = vmatprep.mubr.msk.f32.mxu1 %vm325_vm0, %v320_v4  ;;  %v319_v7 = vld [vmem:[%s298_s16 + $0x8] sm:$0xff]  ;;  %v611_v54 = vld [vmem:[%s1218_s5 + $0x78] sm:$0xff] }
  0x12   : > { %864 = vmatprep.mubr.msk.f32.mxu0 %vm407_vm1, %v318_v6  ;;  %860 = vmatmul.mubr.msk.f32.vlgmr.msra.gmra.mrb[0].mxu1 %vm325_vm0, %v321_v5  ;;  %v1001_v55 = vpack.c.bf16 %v611_v54, %v610_v52 }
  0x13   : > { %865 = vmatmul.mubr.msk.f32.vlgmr.msra.gmra.mrb[0].mxu0 %vm407_vm1, %v319_v7  ;;  %944 = vmatpush3.bf16.msra.mxu1 %v941_v11 }
  0x14   : > { %976 = vmatpush3.bf16.msra.mxu0 %v973_v13  ;;  %946 = vmatprep.subr.bf16.mxu1 %v945_v17 }
  0x15   : > { %978 = vmatprep.subr.bf16.mxu0 %v977_v19 }
  0x17   : > { %948 = vmatpush3.bf16.msra.mxu1 %v945_v17 }
  0x18   : > { %980 = vmatpush3.bf16.msra.mxu0 %v977_v19  ;;  %950 = vmatprep.subr.bf16.mxu1 %v949_v23 }
  0x19   : > { %982 = vmatprep.subr.bf16.mxu0 %v981_v25 }
  0x1b   : > { %952 = vmatpush3.bf16.msra.mxu1 %v949_v23 }
  0x1c   : > { %984 = vmatpush3.bf16.msra.mxu0 %v981_v25  ;;  %954 = vmatprep.subr.bf16.mxu1 %v953_v29 }
  0x1d   : > { %986 = vmatprep.subr.bf16.mxu0 %v985_v31 }
  0x1f   : > { %956 = vmatpush3.bf16.msra.mxu1 %v953_v29 }
  0x20   : > { %988 = vmatpush3.bf16.msra.mxu0 %v985_v31  ;;  %958 = vmatprep.subr.bf16.mxu1 %v957_v35 }
  0x21   : > { %990 = vmatprep.subr.bf16.mxu0 %v989_v37 }
  0x23   : > { %960 = vmatpush3.bf16.msra.mxu1 %v957_v35 }
  0x24   : > { %992 = vmatpush3.bf16.msra.mxu0 %v989_v37  ;;  %962 = vmatprep.subr.bf16.mxu1 %v961_v41 }
  0x25   : > { %994 = vmatprep.subr.bf16.mxu0 %v993_v43 }
  0x27   : > { %964 = vmatpush3.bf16.msra.mxu1 %v961_v41 }
  0x28   : > { %996 = vmatpush3.bf16.msra.mxu0 %v993_v43  ;;  %966 = vmatprep.subr.bf16.mxu1 %v965_v47 }
  0x29   : > { %998 = vmatprep.subr.bf16.mxu0 %v997_v49 }
  0x2b   : > { %968 = vmatpush3.bf16.msra.mxu1 %v965_v47 }
  0x2c   : > { %1000 = vmatpush3.bf16.msra.mxu0 %v997_v49  ;;  %970 = vmatprep.subr.bf16.mxu1 %v969_v53 }
  0x2d   : > { %1002 = vmatprep.subr.bf16.mxu0 %v1001_v55 }
  0x2f   : > { %972 = vmatpush3.bf16.msra.mxu1 %v969_v53 }
  0x30   : > { %1004 = vmatpush3.bf16.msra.mxu0 %v1001_v55 }
  0xe5   : > { %v861_v56 = vpop.f32.mrb[0].mxu1 }
  0xe6   : > { %v866_v57 = vpop.f32.mrb[0].mxu0  ;;  %v398_v59 = vpop.f32.mrb[1].mxu1 }
  0xe7   : > { %v486_v58 = vadd.f32 %v866_v57, %v861_v56  ;;  %v480_v60 = vpop.f32.mrb[1].mxu0 }
  0xe8   : > { %v481_v61 = vadd.f32 %v480_v60, %v398_v59 }
  0xe9   : > { %v809_v62 = vmul.f32 -1.442695, %v486_v58 }
  0xea   : > { %v808_v63 = vmul.f32 -1.442695, %v481_v61 }
  0xeb   : > { %1015 = vpow2.f32 %v809_v62 }
  0xec   : > { %1017 = vpow2.f32 %v808_v63 }
  0xf5   : > { %v1016_v0 = vpop.eup %1015 }
  0xf6   : > { %v1018_v1 = vpop.eup %1017  ;;  %v496_v2 = vadd.f32 1.0, %v1016_v0 }
  0xf7   : > { %v495_v3 = vadd.f32 1.0, %v1018_v1 }
  0xf8   : > { %1019 = vrcp.f32 %v496_v2 }
  0xf9   : > { %1021 = vrcp.f32 %v495_v3 }
 0x102   : > { %v1020_v4 = vpop.eup %1019 }
 0x103   : > { %v1022_v5 = vpop.eup %1021  ;;  %v502_v7 = vmul.f32 %v1020_v4, %v486_v58 }
 0x104   : > { %v501_v6 = vmul.f32 %v1022_v5, %v481_v61 }
 0x106   : > { %899 = vmatprep.mubr.f32.mxu1 %v501_v6  ;;  %934 = vmatprep.mubr.f32.mxu0 %v501_v6 }
 0x107   : > { %900 = vmatmul.mubr.f32.vlgmr.msra.gmra.mrb[2].mxu1 %v502_v7  ;;  %935 = vmatmul.mubr.f32.vlgmr.msra.gmra.mrb[2].mxu0 %v502_v7 }
 0x1da   : > { %v901_v8 = vpop.f32.mrb[2].mxu1  ;;  %v936_v9 = vpop.f32.mrb[2].mxu0 }
 0x1db   : > { %v585_v10 = vpop.f32.mrb[3].mxu1  ;;  %v678_v11 = vpop.f32.mrb[3].mxu0  ;;  %595 = vst.msk [vmem:[%s310_s20 + $0x8] sm:$0xff] %vm407_vm1, %v901_v8 }
 0x1dc   : > { %594 = vst.msk [vmem:[%s310_s20] sm:$0xff] %vm407_vm1, %v585_v10 }
 0x1dd   : > { %687 = vst.msk [vmem:[%s316_s23] sm:$0xff] %vm325_vm0, %v678_v11  ;;  %688 = vst.msk [vmem:[%s316_s23 + $0x8] sm:$0xff] %vm325_vm0, %v936_v9 }
 0x1de PF: > { %s18_s24 = sadd.s32 1, %s1029_s24  }
 0x1df   : > { %p15_p4 = scmp.ge.s32.totalorder %s18_s24, 4  }
 0x1e1   :  { %17 = sbr.rel (!%p15_p4) target bundleno = 1 (0x1), region = 89 }

</bundles_post_ra>
